<compile_context>
chip_gen: v7x
topology: tpu7x:2x2x1
jax: 0.10.0
libtpu: 0.0.40
codegen_flags: <defaults>
</compile_context>

<pallas_src>
import functools

import jax
import jax.numpy as jnp
from jax.experimental import pallas as pl
from jax.experimental.pallas import tpu as pltpu

D_IN, H1, H2, D_OUT = 28 * 28, 300, 100, 10
# Lane-aligned (multiple-of-128) padded feature widths.
H1_P, H2_P, D_OUT_P = 384, 128, 128


def mlp_kernel(x_ref, w1_ref, b1_ref, w2_ref, b2_ref, w3_ref, b3_ref, o_ref):
    # Cast the f32 input tile to bf16 in-kernel (VPU, free slot) right before
    # the MXU; accumulation stays f32.
    x = x_ref[...].astype(jnp.bfloat16)

    # Layer 1: Linear(784 -> 384pad) + ReLU
    h1 = jnp.dot(x, w1_ref[...], preferred_element_type=jnp.float32)
    h1 = jnp.maximum(h1 + b1_ref[...], 0.0)

    # Layer 2: Linear(384pad -> 128pad) + ReLU
    h2 = jnp.dot(h1.astype(jnp.bfloat16), w2_ref[...],
                 preferred_element_type=jnp.float32)
    h2 = jnp.maximum(h2 + b2_ref[...], 0.0)

    # Layer 3: Linear(128pad -> 128pad), no activation (cols >= 10 are zero pad)
    out = jnp.dot(h2.astype(jnp.bfloat16), w3_ref[...],
                  preferred_element_type=jnp.float32)
    o_ref[...] = (out + b3_ref[...]).astype(o_ref.dtype)


@functools.partial(jax.jit, static_argnames=("tile_b",))
def _mlp_forward_impl(x, w1, b1, w2, b2, w3, b3, *, tile_b):
    B = x.shape[0]
    grid = (pl.cdiv(B, tile_b),)  # ragged last block handled by Pallas

    # Weights/biases (~0.8 MiB bf16) stay resident in VMEM every grid step;
    # only the batch dim is tiled.
    # TODO(synk): mark these with pipeline_mode=pl.Buffered(1) once single-
    # buffered constant blocks are verified on the target jax version.
    full = lambda shape: pl.BlockSpec(shape, lambda i: (0,) * len(shape))

    out_pad = pl.pallas_call(
        mlp_kernel,
        out_shape=jax.ShapeDtypeStruct((B, D_OUT_P), jnp.bfloat16),
        grid=grid,
        in_specs=[
            pl.BlockSpec((tile_b, D_IN), lambda i: (i, 0)),  # x tile (f32)
            full((D_IN, H1_P)),
            full((1, H1_P)),
            full((H1_P, H2_P)),
            full((1, H2_P)),
            full((H2_P, D_OUT_P)),
            full((1, D_OUT_P)),
        ],
        out_specs=pl.BlockSpec((tile_b, D_OUT_P), lambda i: (i, 0)),
        compiler_params=pltpu.CompilerParams(
            dimension_semantics=("parallel",),  # shards batch across v7x TCs
        ),
    )(x, w1, b1, w2, b2, w3, b3)

    # Slice off the lane padding inside the same compiled program; return f32
    # logits to match the PyTorch module's output dtype.
    return out_pad[:, :D_OUT].astype(jnp.float32)


def _pick_tile_b(B, max_tile=1024, min_tile=128):
    """Batch tile: >=4 grid steps when possible, multiple of 8, <= max_tile."""
    if B <= min_tile:
        return max(8, -(-B // 8) * 8)          # round up to sublane multiple
    t = -(-B // 4)                             # ceil(B / 4) -> >= 4 steps
    t = -(-t // 8) * 8
    return max(min_tile, min(max_tile, t))


def prepare_params(w1, b1, w2, b2, w3, b3):
    """One-time weight prep: zero-pad narrow feature dims to lane-aligned
    widths, weights -> bf16, biases stay f32 (added to the f32 accumulator).
    Padded columns/rows are exactly zero so they contribute nothing."""
    def pad_to(a, shape):
        return jnp.pad(a, [(0, t - s) for s, t in zip(a.shape, shape)])

    w1p = pad_to(w1, (D_IN, H1_P)).astype(jnp.bfloat16)
    b1p = pad_to(b1.reshape(1, -1), (1, H1_P)).astype(jnp.float32)
    w2p = pad_to(w2, (H1_P, H2_P)).astype(jnp.bfloat16)
    b2p = pad_to(b2.reshape(1, -1), (1, H2_P)).astype(jnp.float32)
    w3p = pad_to(w3, (H2_P, D_OUT_P)).astype(jnp.bfloat16)
    b3p = pad_to(b3.reshape(1, -1), (1, D_OUT_P)).astype(jnp.float32)
    return w1p, b1p, w2p, b2p, w3p, b3p


def mlp_forward(x, params, *, tile_b=None):
    """x: (B, 784) f32. params: output of prepare_params. Returns (B, 10) f32."""
    if tile_b is None:
        tile_b = _pick_tile_b(x.shape[0])
    return _mlp_forward_impl(x, *params, tile_b=tile_b)


def init_linear(key, fan_in, fan_out):
    """PyTorch nn.Linear default init: U(-1/sqrt(fan_in), 1/sqrt(fan_in))."""
    kw, kb = jax.random.split(key)
    bound = 1.0 / (fan_in ** 0.5)
    w = jax.random.uniform(kw, (fan_in, fan_out), jnp.float32, -bound, bound)
    b = jax.random.uniform(kb, (1, fan_out), jnp.float32, -bound, bound)
    return w, b


if __name__ == "__main__":
    key = jax.random.PRNGKey(0)
    kx, k1, k2, k3 = jax.random.split(key, 4)

    # Small test shapes: B=37 (non-multiple of 8) with tile_b=16 exercises
    # multiple grid steps AND the ragged (clipped) last block with no padding.
    B = 37
    x = jax.random.normal(kx, (B, D_IN), jnp.float32)

    w1, b1 = init_linear(k1, D_IN, H1)
    w2, b2 = init_linear(k2, H1, H2)
    w3, b3 = init_linear(k3, H2, D_OUT)

    params = prepare_params(w1, b1, w2, b2, w3, b3)
    out = mlp_forward(x, params, tile_b=16)
    jax.block_until_ready(out)
    assert out.shape == (B, D_OUT)

    # bf16-faithful pure-JAX reference of the same forward pass.
    def ref_bf16(xv):
        h = jnp.maximum(jnp.dot(xv.astype(jnp.bfloat16), w1.astype(jnp.bfloat16),
                                preferred_element_type=jnp.float32) + b1, 0.0)
        h = jnp.maximum(jnp.dot(h.astype(jnp.bfloat16), w2.astype(jnp.bfloat16),
                                preferred_element_type=jnp.float32) + b2, 0.0)
        return jnp.dot(h.astype(jnp.bfloat16), w3.astype(jnp.bfloat16),
                       preferred_element_type=jnp.float32) + b3

    ref = ref_bf16(x)
    assert jnp.allclose(out, ref, atol=3e-2, rtol=3e-2), \
        float(jnp.max(jnp.abs(out - ref)))

    # Loose sanity check against the exact f32 PyTorch-equivalent forward pass.
    ref32 = jnp.maximum(x @ w1 + b1, 0.0)
    ref32 = jnp.maximum(ref32 @ w2 + b2, 0.0)
    ref32 = ref32 @ w3 + b3
    assert jnp.allclose(out, ref32, atol=6e-2, rtol=6e-2), \
        float(jnp.max(jnp.abs(out - ref32)))

    print("KERNEL_OK")
</pallas_src>

<mosaic_0001>
module attributes {stable_mosaic.version = 11 : i64} {
  func.func @mlp_kernel(%arg0: i32, %arg1: memref<16x784xf32, #tpu.memory_space<vmem>>, %arg2: memref<784x384xbf16, #tpu.memory_space<vmem>>, %arg3: memref<1x384xf32, #tpu.memory_space<vmem>>, %arg4: memref<384x128xbf16, #tpu.memory_space<vmem>>, %arg5: memref<1x128xf32, #tpu.memory_space<vmem>>, %arg6: memref<128x128xbf16, #tpu.memory_space<vmem>>, %arg7: memref<1x128xf32, #tpu.memory_space<vmem>>, %arg8: memref<16x128xbf16, #tpu.memory_space<vmem>>) attributes {dimension_semantics = [#tpu.dimension_semantics<parallel>], iteration_bounds = array<i64: 3>, scalar_prefetch = 0 : i64, scratch_operands = 0 : i64, tpu.core_type = #tpu.core_type<tc>, window_params = [{transform_indices = @transform_0, window_bounds = array<i64: 16, 784>}, {pipeline_mode = #tpu.pipeline_mode<synchronous>, transform_indices = @transform_1, window_bounds = array<i64: 784, 384>}, {pipeline_mode = #tpu.pipeline_mode<synchronous>, transform_indices = @transform_2, window_bounds = array<i64: 1, 384>}, {pipeline_mode = #tpu.pipeline_mode<synchronous>, transform_indices = @transform_3, window_bounds = array<i64: 384, 128>}, {pipeline_mode = #tpu.pipeline_mode<synchronous>, transform_indices = @transform_4, window_bounds = array<i64: 1, 128>}, {pipeline_mode = #tpu.pipeline_mode<synchronous>, transform_indices = @transform_5, window_bounds = array<i64: 128, 128>}, {pipeline_mode = #tpu.pipeline_mode<synchronous>, transform_indices = @transform_6, window_bounds = array<i64: 1, 128>}, {transform_indices = @transform_7, window_bounds = array<i64: 16, 128>}]} {
    %c0 = arith.constant 0 : index
    %c0_0 = arith.constant 0 : index
    %0 = vector.load %arg1[%c0, %c0_0] : memref<16x784xf32, #tpu.memory_space<vmem>>, vector<16x784xf32>
    %1 = arith.truncf %0 : vector<16x784xf32> to vector<16x784xbf16>
    %c0_1 = arith.constant 0 : index
    %c0_2 = arith.constant 0 : index
    %2 = vector.load %arg2[%c0_1, %c0_2] : memref<784x384xbf16, #tpu.memory_space<vmem>>, vector<784x384xbf16>
    %cst = arith.constant dense<0.000000e+00> : vector<16x384xf32>
    %3 = tpu.matmul %1, %2, %cst {dimension_numbers = #tpu.dot_dimension_numbers<[1], [0], [0], [1], [0, 0, 1, 1], [], []>} : vector<16x784xbf16>, vector<784x384xbf16>, vector<16x384xf32> -> vector<16x384xf32>
    %c0_3 = arith.constant 0 : index
    %c0_4 = arith.constant 0 : index
    %4 = vector.load %arg3[%c0_3, %c0_4] : memref<1x384xf32, #tpu.memory_space<vmem>>, vector<1x384xf32>
    %5 = vector.broadcast %4 : vector<1x384xf32> to vector<16x384xf32>
    %6 = arith.addf %3, %5 : vector<16x384xf32>
    %cst_5 = arith.constant 0.000000e+00 : f32
    %7 = vector.broadcast %cst_5 : f32 to vector<16x384xf32>
    %8 = arith.maximumf %6, %7 : vector<16x384xf32>
    %9 = arith.truncf %8 : vector<16x384xf32> to vector<16x384xbf16>
    %c0_6 = arith.constant 0 : index
    %c0_7 = arith.constant 0 : index
    %10 = vector.load %arg4[%c0_6, %c0_7] : memref<384x128xbf16, #tpu.memory_space<vmem>>, vector<384x128xbf16>
    %cst_8 = arith.constant dense<0.000000e+00> : vector<16x128xf32>
    %11 = tpu.matmul %9, %10, %cst_8 {dimension_numbers = #tpu.dot_dimension_numbers<[1], [0], [0], [1], [0, 0, 1, 1], [], []>} : vector<16x384xbf16>, vector<384x128xbf16>, vector<16x128xf32> -> vector<16x128xf32>
    %c0_9 = arith.constant 0 : index
    %c0_10 = arith.constant 0 : index
    %12 = vector.load %arg5[%c0_9, %c0_10] : memref<1x128xf32, #tpu.memory_space<vmem>>, vector<1x128xf32>
    %13 = vector.broadcast %12 : vector<1x128xf32> to vector<16x128xf32>
    %14 = arith.addf %11, %13 : vector<16x128xf32>
    %cst_11 = arith.constant 0.000000e+00 : f32
    %15 = vector.broadcast %cst_11 : f32 to vector<16x128xf32>
    %16 = arith.maximumf %14, %15 : vector<16x128xf32>
    %17 = arith.truncf %16 : vector<16x128xf32> to vector<16x128xbf16>
    %c0_12 = arith.constant 0 : index
    %c0_13 = arith.constant 0 : index
    %18 = vector.load %arg6[%c0_12, %c0_13] : memref<128x128xbf16, #tpu.memory_space<vmem>>, vector<128x128xbf16>
    %cst_14 = arith.constant dense<0.000000e+00> : vector<16x128xf32>
    %19 = tpu.matmul %17, %18, %cst_14 {dimension_numbers = #tpu.dot_dimension_numbers<[1], [0], [0], [1], [0, 0, 1, 1], [], []>} : vector<16x128xbf16>, vector<128x128xbf16>, vector<16x128xf32> -> vector<16x128xf32>
    %c0_15 = arith.constant 0 : index
    %c0_16 = arith.constant 0 : index
    %20 = vector.load %arg7[%c0_15, %c0_16] : memref<1x128xf32, #tpu.memory_space<vmem>>, vector<1x128xf32>
    %21 = vector.broadcast %20 : vector<1x128xf32> to vector<16x128xf32>
    %22 = arith.addf %19, %21 : vector<16x128xf32>
    %23 = arith.truncf %22 : vector<16x128xf32> to vector<16x128xbf16>
    %c0_17 = arith.constant 0 : index
    %c0_18 = arith.constant 0 : index
    %24 = vector.load %arg8[%c0_17, %c0_18] : memref<16x128xbf16, #tpu.memory_space<vmem>>, vector<16x128xbf16>
    tpu.vector_store %arg8[%c0_17, %c0_18], %23 {strides = array<i32>} : memref<16x128xbf16, #tpu.memory_space<vmem>>, vector<16x128xbf16>,
    return
  }
  func.func @transform_0(%arg0: i32) -> (i32, i32) {
    %c0_i32 = arith.constant 0 : i32
    %c0_i32_0 = arith.constant 0 : i32
    return %arg0, %c0_i32 : i32, i32
  }
  func.func @transform_1(%arg0: i32) -> (i32, i32) {
    %c0_i32 = arith.constant 0 : i32
    %c0_i32_0 = arith.constant 0 : i32
    %c0_i32_1 = arith.constant 0 : i32
    return %c0_i32, %c0_i32_0 : i32, i32
  }
  func.func @transform_2(%arg0: i32) -> (i32, i32) {
    %c0_i32 = arith.constant 0 : i32
    %c0_i32_0 = arith.constant 0 : i32
    %c0_i32_1 = arith.constant 0 : i32
    return %c0_i32, %c0_i32_0 : i32, i32
  }
  func.func @transform_3(%arg0: i32) -> (i32, i32) {
    %c0_i32 = arith.constant 0 : i32
    %c0_i32_0 = arith.constant 0 : i32
    %c0_i32_1 = arith.constant 0 : i32
    return %c0_i32, %c0_i32_0 : i32, i32
  }
  func.func @transform_4(%arg0: i32) -> (i32, i32) {
    %c0_i32 = arith.constant 0 : i32
    %c0_i32_0 = arith.constant 0 : i32
    %c0_i32_1 = arith.constant 0 : i32
    return %c0_i32, %c0_i32_0 : i32, i32
  }
  func.func @transform_5(%arg0: i32) -> (i32, i32) {
    %c0_i32 = arith.constant 0 : i32
    %c0_i32_0 = arith.constant 0 : i32
    %c0_i32_1 = arith.constant 0 : i32
    return %c0_i32, %c0_i32_0 : i32, i32
  }
  func.func @transform_6(%arg0: i32) -> (i32, i32) {
    %c0_i32 = arith.constant 0 : i32
    %c0_i32_0 = arith.constant 0 : i32
    %c0_i32_1 = arith.constant 0 : i32
    return %c0_i32, %c0_i32_0 : i32, i32
  }
  func.func @transform_7(%arg0: i32) -> (i32, i32) {
    %c0_i32 = arith.constant 0 : i32
    %c0_i32_0 = arith.constant 0 : i32
    return %arg0, %c0_i32 : i32, i32
  }
}

</mosaic_0001>

<bundles_post_ra>
// kernel: _mlp_forward_impl.1
= control target key start
LH: loop header
LB: loop body
LE: loop exit
PB: predicated region body
PF: predicated region fallthrough
CT: control target
= control target key end

     0   :  { %s3734_s0 = inlined_call_operand.hbm [shape: f32[37,784], index: 0, kind: input, shape index: {}]   ;;  %s3735_s1 = inlined_call_operand.hbm [shape: bf16[784,384], index: 1, kind: input, shape index: {}]   ;;  %s3736_s2 = inlined_call_operand.vmem [shape: f32[1,384], index: 2, kind: input, shape index: {}]   ;;  %s3737_s3 = inlined_call_operand.hbm [shape: bf16[384,128], index: 3, kind: input, shape index: {}]   ;;  %s3738_s4 = inlined_call_operand.vmem [shape: f32[1,128], index: 4, kind: input, shape index: {}]   ;;  %s3739_s5 = inlined_call_operand.hbm [shape: bf16[128,128], index: 5, kind: input, shape index: {}]   ;;  %s3740_s6 = inlined_call_operand.vmem [shape: f32[1,128], index: 6, kind: input, shape index: {}]   ;;  %s3741_s7 = inlined_call_operand.vmem [shape: bf16[37,128], index: 7, kind: output, shape index: {}]  }
   0x1   :  { %3747 = sst [smem:[#allocation15_spill]] %s3735_s1 }
   0x2   :  { %12 = vsyncpa [#allocation3], 0 }
   0x3   :  { %14 = vsyncpa [#allocation3 + $0x1], 0 }
   0x4   :  { %15 = vsyncpa [#allocation5], 0 }
   0x5   :  { %16 = vsyncpa [#allocation8], 0  ;;  %s3429_s24 = smov 0   ;;  %s3431_s25 = smov 0  }
   0x6   :  { %s3433_s26 = smov 0   ;;  %s3435_s27 = smov 0  }
   0x7 LB: > { %s3448_s28 = sadd.s32 4294967295, %s3342_s27   ;;  %s3451_s29 = sadd.s32 1, %s3342_s27   ;;  %s3342_s27 = sphi %s3435_s27, %s3765_s27   ;;  %s3338_s26 = sphi %s3433_s26, %s3769_s26   ;;  %s3334_s25 = sphi %s3431_s25, %s3768_s25   ;;  %s3330_s24 = sphi %s3429_s24, %s3767_s24  }
   0x8   : > { %3748 = sst [smem:[#allocation13_spill]] %s3451_s29  ;;  %s26_s30 = ssub.s32 %s3342_s27, %s3451_s29 }
   0x9   : > { %s29_s8 = sadd.s32 1, %s3338_s26  ;;  %p27_p0 = scmp.eq.s32.totalorder %s26_s30, 0 }
   0xa   : > { %p36_p1 = scmp.ne.s32.totalorder %s3338_s26, %s3334_s25  ;;  %p37_p2 = scmp.eq.s32.totalorder %s3342_s27, 0 }
   0xb   : > { %p42_p3 = scmp.ne.s32.totalorder %s3334_s25, %s3330_s24  ;;  %p3742_p5 = scmp.eq.s32.totalorder %s3448_s28, 0 }
   0xc   : > { %s3461_s9 = scalar_select %p27_p0, %s3338_s26, %s29_s8  }
   0xd   : > { %p3463_p4 = por %p37_p2, %p36_p1  ;;  %p192_p6 = scmp.eq.s32.totalorder %s3448_s28, 2 }
   0xe   : > { %3749 = sst [smem:[#allocation14_spill]] %s3461_s9  ;;  %p2389_p7 = scmp.ge.s32.totalorder %s3342_s27, 1 }
   0xf   : > { %s3750_s10 = scalar_select %p3463_p4, 1, 0 }
  0x10   : > { %p3472_p8 = por %p3742_p5, %p42_p3  ;;  %p205_p9 = scmp.lt.s32.totalorder %s3342_s27, 4 }
  0x11   : > { %p3477_p10 = por %p192_p6, %p36_p1  ;;  %s3376_s14 = smov [#allocation4]  }
  0x12   : > { %s3751_s11 = scalar_select %p3472_p8, 1, 0 }
  0x13   : > { %s3752_s12 = scalar_select %p3477_p10, 1, 0 }
  0x14   : > { %p3481_p11 = pnand %p2389_p7, %p205_p9  ;;  %s217_s15 = sshll.u32 %s3376_s14, 4  ;;  %s218_s15 = int_to_ptr.vmem [resolvable:$true] %s217_s15 }
  0x15   : > { %s3377_s17 = smov [#allocation6]   ;;  %s3755_s1 = sld [smem:[#allocation15_spill]] }
  0x16   : > { %s3753_s13 = scalar_select %p3481_p11, 1, 0 }
  0x17   : > { %p2804_p12 = pneg %p3481_p11  ;;  %s233_s18 = sshll.u32 %s3377_s17, 4  ;;  %s3493_s18 = int_to_ptr.vmem [resolvable:$true] %s233_s18 }
  0x19   : > { %p3489_p13 = pnand %p2804_p12, %p3742_p5 }
  0x1b   : > { %s3156_s21 = scalar_lea.hbm %s3755_s1, 18816  ;;  %p3503_p1 = pneg %p3489_p13 }
  0x1c   : > { %p3157_p0 = scmp.ne.s32.totalorder %s3755_s1, %s3156_s21  ;;  %p3163_p6 = scmp.lt.u32.totalorder %s3156_s21, %s3755_s1 }
  0x1e   : > { %p3159_p2 = pnand %p3503_p1, %p3157_p0 }
  0x20   : > { %p3160_p3 = pneg %p3159_p2 }
  0x22   : > { %p3165_p7 = pnand %p3163_p6, %p3160_p3 }
  0x24   : > { %3168 = shalt.err (!%p3165_p7)
}
  0x25   : > { %s3169_s14 = scalar_lea.vmem %s218_s15, 18816  ;;  %p3177_p10 = scmp.lt.s32.totalorder %s218_s15, %s218_s15 }
  0x26   : > { %p3170_p9 = scmp.ne.s32.totalorder %s218_s15, %s3169_s14  ;;  %p3178_p8 = scmp.lt.s32.totalorder %s3169_s14, %s3169_s14 }
  0x28   : > { %p3172_p12 = pnand %p3170_p9, %p3503_p1  ;;  %p3179_p11 = por %p3178_p8, %p3177_p10 }
  0x2a   : > { %p3173_p5 = pneg %p3172_p12 }
  0x2c   : > { %p3180_p4 = pnand %p3179_p11, %p3173_p5 }
  0x2e   : > { %3183 = shalt.err (!%p3180_p4)
}
  0x2f   : > { %s3378_s17 = smov 192   ;;  %s3379_s19 = smov 12  }
  0x30   : > { %2807 = dma.hbm_to_vmem [thread:$0]  (!%p3489_p13), %s3755_s1, 18816, %s218_s15, [#allocation5], %s3378_s17, %s3378_s17, %s3379_s19  }
  0x31   : > { %s3184_s30 = scalar_lea.hbm %s3737_s3, 3072 }
  0x32   : > { %p3185_p0 = scmp.ne.s32.totalorder %s3737_s3, %s3184_s30  ;;  %p3191_p8 = scmp.lt.u32.totalorder %s3184_s30, %s3737_s3 }
  0x34   : > { %p3187_p5 = pnand %p3185_p0, %p3503_p1 }
  0x36   : > { %p3188_p4 = pneg %p3187_p5 }
  0x38   : > { %p3193_p10 = pnand %p3191_p8, %p3188_p4 }
  0x3a   : > { %3196 = shalt.err (!%p3193_p10)
}
  0x3b   : > { %s3197_s15 = scalar_lea.vmem %s3493_s18, 3072  ;;  %p3205_p6 = scmp.lt.s32.totalorder %s3493_s18, %s3493_s18 }
  0x3c   : > { %p3198_p11 = scmp.ne.s32.totalorder %s3493_s18, %s3197_s15  ;;  %p3206_p7 = scmp.lt.s32.totalorder %s3197_s15, %s3197_s15 }
  0x3e   : > { %p3200_p2 = pnand %p3198_p11, %p3503_p1  ;;  %p3207_p9 = por %p3206_p7, %p3205_p6 }
  0x40   : > { %p3201_p3 = pneg %p3200_p2 }
  0x42   : > { %p3208_p12 = pnand %p3207_p9, %p3201_p3 }
  0x44   : > { %3211 = shalt.err (!%p3208_p12)
}
  0x45   : > { %s3380_s9 = smov 64   ;;  %s3381_s29 = smov 4  }
  0x46   : > { %2810 = dma.hbm_to_vmem [thread:$0]  (!%p3489_p13), %s3737_s3, 3072, %s3493_s18, [#allocation5], %s3380_s9, %s3380_s9, %s3381_s29  }
  0x47   : > { %s3382_s20 = smov [#allocation7]   ;;  %s3212_s30 = scalar_lea.hbm %s3739_s5, 1024 }
  0x48   : > { %s249_s21 = sshll.u32 %s3382_s20, 4  ;;  %p3213_p0 = scmp.ne.s32.totalorder %s3739_s5, %s3212_s30  ;;  %s250_s21 = int_to_ptr.vmem [resolvable:$true] %s249_s21 }
  0x49   : > { %p3219_p8 = scmp.lt.u32.totalorder %s3212_s30, %s3739_s5 }
  0x4a   : > { %p3215_p5 = pnand %p3213_p0, %p3503_p1 }
  0x4c   : > { %p3216_p4 = pneg %p3215_p5 }
  0x4e   : > { %p3221_p10 = pnand %p3219_p8, %p3216_p4 }
  0x50   : > { %3224 = shalt.err (!%p3221_p10)
}
  0x51   : > { %s3225_s18 = scalar_lea.vmem %s250_s21, 1024  ;;  %p3233_p6 = scmp.lt.s32.totalorder %s250_s21, %s250_s21 }
  0x52   : > { %p3226_p11 = scmp.ne.s32.totalorder %s250_s21, %s3225_s18  ;;  %p3234_p7 = scmp.lt.s32.totalorder %s3225_s18, %s3225_s18 }
  0x54   : > { %p3228_p2 = pnand %p3226_p11, %p3503_p1  ;;  %p3235_p9 = por %p3234_p7, %p3233_p6 }
  0x56   : > { %p3229_p3 = pneg %p3228_p2 }
  0x58   : > { %p3236_p12 = pnand %p3235_p9, %p3229_p3 }
  0x5a   : > { %3239 = shalt.err (!%p3236_p12)
}
  0x5b   : > { %2813 = dma.hbm_to_vmem [thread:$0]  (!%p3489_p13), %s3739_s5, 1024, %s250_s21, [#allocation8], %s3380_s9, %s3380_s9, %s3381_s29  }
  0x5c   : > { %p2393_p0 = scmp.ge.s32.totalorder %s3342_s27, 3 }
  0x5d   : > { %p3757_p5 = scmp.ne.s32.totalorder (!%p2393_p0), %s3750_s10, 0 }
  0x5e   : > { %262 = sbr.rel (%p2393_p0) target bundleno = 137 (0x89), region = 40 }
  0x65   : > { %265 = sbr.rel (!%p3757_p5) target bundleno = 137 (0x89), region = 44  ;;  %s266_s1 = sand.u32 (%p3757_p5), 1, %s3338_s26  }
  0x66   : > { %s2394_s24 = sshll.u32 (%p3757_p5), %s3342_s27, 1  ;;  %s2788_s20 = smul.u32 (%p3757_p5), 112, %s266_s1 }
  0x67   : > { %s272_s22 = ssub.s32 (%p3757_p5), 5, %s2394_s24  ;;  %s3568_s30 = scalar_lea.sflag (%p3757_p5), [#allocation3], %s266_s1 }
  0x68   : > { %p273_p1 = scmp.lt.s32.totalorder (%p3757_p5), %s272_s22, 2  ;;  %s270_s9 = scalar_lea.vmem (%p3757_p5), [#allocation2], %s2788_s20 }
  0x6c   : > { %s3771_s22 = smov (!%p273_p1, %s272_s22), 2 }
  0x6d   : > { %s3565_s23 = smul.u32 896, %s3771_s22 }
  0x6f   : > { %s278_s16 = ssub.s32 1792, %s3565_s23 }
  0x70   : > { %279 = vsyncadd %s3568_s30, %s278_s16  ;;  %p2397_p13 = scmp.ne.s32.totalorder %s3565_s23, 0  ;;  %s2789_s10 = smul.u32 1792, %s3342_s27 }
  0x71   : > { %s285_s29 = sshll.u32 %s270_s9, 4  ;;  %s3244_s27 = scalar_lea.hbm %s3734_s0, 4480  ;;  %s3578_s29 = int_to_ptr.vmem [resolvable:$true] %s285_s29 }
  0x72   : > { %s3576_s14 = scalar_lea.hbm %s3734_s0, %s2789_s10 }
  0x73   : > { %s3240_s15 = scalar_lea.hbm %s3576_s14, %s3565_s23  ;;  %p3245_p11 = scmp.lt.u32.totalorder %s3576_s14, %s3734_s0 }
  0x74   : > { %p3241_p4 = scmp.ne.s32.totalorder %s3576_s14, %s3240_s15  ;;  %p3246_p2 = scmp.lt.u32.totalorder %s3244_s27, %s3240_s15 }
  0x75   : > { %p3248_p6 = scmp.lt.u32.totalorder %s3240_s15, %s3576_s14 }
  0x76   : > { %p3242_p8 = pnand %p3241_p4, %p2397_p13  ;;  %p3247_p3 = por %p3246_p2, %p3245_p11 }
  0x78   : > { %p3243_p10 = pneg %p3242_p8  ;;  %p3249_p7 = por %p3248_p6, %p3247_p3 }
  0x7a   : > { %p3250_p9 = pnand %p3249_p7, %p3243_p10 }
  0x7c   : > { %3253 = shalt.err (!%p3250_p9)
}
  0x7d   : > { %s3254_s24 = scalar_lea.vmem %s3578_s29, %s3565_s23  ;;  %s3383_s20 = smov [#allocation2]  }
  0x7e   : > { %p3255_p12 = scmp.ne.s32.totalorder %s3578_s29, %s3254_s24  ;;  %s3258_s22 = sshll.u32 %s3383_s20, 4  ;;  %s3259_s22 = int_to_ptr.vmem [resolvable:$false] %s3258_s22 }
  0x7f   : > { %s3260_s16 = scalar_lea.vmem %s3259_s22, 3584  ;;  %p3261_p1 = scmp.lt.s32.totalorder %s3578_s29, %s3259_s22 }
  0x80   : > { %p3256_p0 = pnand %p3255_p12, %p2397_p13  ;;  %p3262_p4 = scmp.lt.s32.totalorder %s3260_s16, %s3254_s24 }
  0x82   : > { %p3257_p5 = pneg %p3256_p0  ;;  %p3263_p8 = por %p3262_p4, %p3261_p1 }
  0x84   : > { %p3264_p11 = pnand %p3263_p8, %p3257_p5 }
  0x86   : > { %3267 = shalt.err (!%p3264_p11)
}
  0x87   : > { %s3384_s9 = smov 896   ;;  %s3385_s10 = smov 56  }
  0x88   : > { %291 = dma.hbm_to_vmem [thread:$0]  (%p2397_p13), %s3576_s14, %s3565_s23, %s3578_s29, %s3568_s30, %s3384_s9, %s3384_s9, %s3385_s10  }
  0x89 PF: > { %p3758_p10 = scmp.ne.s32.totalorder %s3753_s13, 0 }
  0x8a   : > { %s3608_s21 = sand.u32 (!%p3758_p10), 1, %s3334_s25   ;;  %p3759_p2 = scmp.ne.s32.totalorder (!%p3758_p10), %s3751_s11, 0 }
  0x8b   : > { %297 = sbr.rel (%p3758_p10) target bundleno = 1101 (0x44d), region = 48  ;;  %s300_s15 = scalar_lea.sflag (!%p3758_p10), [#allocation3], %s3608_s21 }
  0x8c   : > { %s2790_s8 = smul.u32 (!%p3758_p10), 112, %s3608_s21 }
  0x8e   : > { %s3612_s18 = scalar_lea.vmem (!%p3758_p10), [#allocation2], %s2790_s8 }
  0x92   : > { %3317 = dma.done.wait (%p3759_p2), %s300_s15, 1792  }
  0x93   : > { %3319 = vsyncadd (%p3759_p2), %s300_s15, 4294965504  ;;  %p3760_p13 = scmp.eq.s32.totalorder %s3448_s28, 0 }
  0x95   : > { %3321 = dma.done.wait (%p3760_p13), [#allocation5], 21888   ;;  %p3761_p3 = pmov %p3760_p13 }
  0x97   : > { %3323 = vsyncadd (%p3761_p3), [#allocation5], 4294945408  ;;  %p3762_p6 = pmov %p3761_p3 }
  0x98   : > { %p3763_p7 = pmov %p3761_p3 }
  0x99   : > { %3325 = dma.done.wait (%p3762_p6), [#allocation8], 1024  }
  0x9a   : > { %3327 = vsyncadd (%p3763_p7), [#allocation8], 4294966272  ;;  %v2928_v0 = vld [vmem:[#allocation4 + $0x4] ss:$12 sps:$4 sm:$0xff]   ;;  %v2930_v1 = vld [vmem:[#allocation4] ss:$12 sps:$4 sm:$0xff]  }
  0x9b   : > { %1379 = vmatprep.subr.bf16.mxu0 %v2928_v0  ;;  %v2931_v2 = vld [vmem:[#allocation4 + $0x1c] ss:$12 sps:$4 sm:$0xff]   ;;  %v2933_v3 = vld [vmem:[#allocation4 + $0x18] ss:$12 sps:$4 sm:$0xff]   ;;  %v2934_v4 = vld [vmem:[#allocation4 + $0x34] ss:$12 sps:$4 sm:$0xff]  }
  0x9c   : > { %1380 = vmatpush1.bf16.msra.mxu0 %v2930_v1  ;;  %v2936_v5 = vld [vmem:[#allocation4 + $0x30] ss:$12 sps:$4 sm:$0xff]   ;;  %v2937_v6 = vld [vmem:[#allocation4 + $0x4c] ss:$12 sps:$4 sm:$0xff]   ;;  %v2939_v7 = vld [vmem:[#allocation4 + $0x48] ss:$12 sps:$4 sm:$0xff]  }
  0x9d   : > { %1381 = vmatprep.subr.bf16.mxu0 %v2931_v2  ;;  %v2940_v8 = vld [vmem:[#allocation4 + $0x64] ss:$12 sps:$4 sm:$0xff]   ;;  %v2942_v9 = vld [vmem:[#allocation4 + $0x60] ss:$12 sps:$4 sm:$0xff]   ;;  %v2943_v10 = vld [vmem:[#allocation4 + $0x7c] ss:$12 sps:$4 sm:$0xff]  }
  0x9e   : > { %v2945_v11 = vld [vmem:[#allocation4 + $0x78] ss:$12 sps:$4 sm:$0xff]   ;;  %v2946_v12 = vld [vmem:[#allocation4 + $0x94] ss:$12 sps:$4 sm:$0xff]   ;;  %v2948_v16 = vld [vmem:[#allocation4 + $0x90] ss:$12 sps:$4 sm:$0xff]  }
  0x9f   : > { %v358_v13 = vld [vmem:[%s3612_s18 + $0x8] sm:$0xff]  ;;  %v365_v14 = vld [vmem:[%s3612_s18 + $0x40] sm:$0xff]  ;;  %v364_v51 = vld [vmem:[%s3612_s18 + $0x38] sm:$0xff]  ;;  %vm1375_vm0 = vcmask 130048   ;;  %vm3387_vm1 = vmmov 0   ;;  %s2405_s17 = sshll.u32 %s3608_s21, 3 }
  0xa0   : > { %1382 = vmatpush1.bf16.msra.mxu0 %v2933_v3  ;;  %v372_v15 = vpack.c.bf16 %v365_v14, %v358_v13  ;;  %v2949_v17 = vld [vmem:[#allocation4 + $0xac] ss:$12 sps:$4 sm:$0xff]   ;;  %v2951_v18 = vld [vmem:[#allocation4 + $0xa8] ss:$12 sps:$4 sm:$0xff]   ;;  %v2952_v21 = vld [vmem:[#allocation4 + $0xc4] ss:$12 sps:$4 sm:$0xff]  }
  0xa1   : > { %1383 = vmatprep.subr.bf16.mxu0 %v2934_v4  ;;  %v2982_v19 = vld [vmem:[#allocation4 + $0xc8] ss:$12 sps:$4 sm:$0xff]   ;;  %v2987_v22 = vld [vmem:[#allocation4 + $0xe0] ss:$12 sps:$4 sm:$0xff]   ;;  %v2992_v26 = vld [vmem:[#allocation4 + $0xf8] ss:$12 sps:$4 sm:$0xff]  }
  0xa2   : > { %1411 = vmatprep.mubr.bf16.mxu0 %v372_v15  ;;  %1583 = vmatprep.mubr.bf16.mxu1 %v372_v15  ;;  %v2983_v20 = vld [vmem:[#allocation4 + $0x8] ss:$12 sps:$4 sm:$0xff]   ;;  %v2988_v23 = vld [vmem:[#allocation4 + $0x20] ss:$12 sps:$4 sm:$0xff]   ;;  %v2993_v27 = vld [vmem:[#allocation4 + $0x38] ss:$12 sps:$4 sm:$0xff]  }
  0xa3   : > { %2618 = vmatprep.subr.bf16.mxu1 %v2982_v19  ;;  %v2954_v24 = vld [vmem:[#allocation4 + $0xc0] ss:$12 sps:$4 sm:$0xff]   ;;  %v2955_v25 = vld [vmem:[#allocation4 + $0xdc] ss:$12 sps:$4 sm:$0xff]   ;;  %v2957_v28 = vld [vmem:[#allocation4 + $0xd8] ss:$12 sps:$4 sm:$0xff]  }
  0xa4   : > { %1384 = vmatpush1.bf16.msra.mxu0 %v2936_v5  ;;  %2619 = vmatpush3.bf16.msra.mxu1 %v2983_v20  ;;  %v2958_v29 = vld [vmem:[#allocation4 + $0xf4] ss:$12 sps:$4 sm:$0xff]   ;;  %v2997_v30 = vld [vmem:[#allocation4 + $0x110] ss:$12 sps:$4 sm:$0xff]   ;;  %v2961_v34 = vld [vmem:[#allocation4 + $0x10c] ss:$12 sps:$4 sm:$0xff]  }
  0xa5   : > { %1385 = vmatprep.subr.bf16.mxu0 %v2937_v6  ;;  %2620 = vmatprep.subr.bf16.mxu1 %v2987_v22  ;;  %v2998_v31 = vld [vmem:[#allocation4 + $0x50] ss:$12 sps:$4 sm:$0xff]   ;;  %v3002_v33 = vld [vmem:[#allocation4 + $0x128] ss:$12 sps:$4 sm:$0xff]   ;;  %v3007_v36 = vld [vmem:[#allocation4 + $0x140] ss:$12 sps:$4 sm:$0xff]  }
  0xa6   : > { %v2960_v32 = vld [vmem:[#allocation4 + $0xf0] ss:$12 sps:$4 sm:$0xff]   ;;  %v3003_v35 = vld [vmem:[#allocation4 + $0x68] ss:$12 sps:$4 sm:$0xff]   ;;  %v3008_v39 = vld [vmem:[#allocation4 + $0x80] ss:$12 sps:$4 sm:$0xff]  }
  0xa7   : > { %v2963_v37 = vld [vmem:[#allocation4 + $0x108] ss:$12 sps:$4 sm:$0xff]   ;;  %v2964_v38 = vld [vmem:[#allocation4 + $0x124] ss:$12 sps:$4 sm:$0xff]   ;;  %v2966_v41 = vld [vmem:[#allocation4 + $0x120] ss:$12 sps:$4 sm:$0xff]  }
  0xa8   : > { %1386 = vmatpush1.bf16.msra.mxu0 %v2939_v7  ;;  %2621 = vmatpush3.bf16.msra.mxu1 %v2988_v23  ;;  %v3012_v40 = vld [vmem:[#allocation4 + $0x158] ss:$12 sps:$4 sm:$0xff]   ;;  %v2967_v42 = vld [vmem:[#allocation4 + $0x13c] ss:$12 sps:$4 sm:$0xff]   ;;  %v2970_v46 = vld [vmem:[#allocation4 + $0x154] ss:$12 sps:$4 sm:$0xff]  }
  0xa9   : > { %1387 = vmatprep.subr.bf16.mxu0 %v2940_v8  ;;  %2622 = vmatprep.subr.bf16.mxu1 %v2992_v26  ;;  %v3013_v43 = vld [vmem:[#allocation4 + $0x98] ss:$12 sps:$4 sm:$0xff]   ;;  %v3017_v44 = vld [vmem:[#allocation4 + $0x170] ss:$12 sps:$4 sm:$0xff]   ;;  %v3022_v50 = vld [vmem:[#allocation4 + $0x248] ss:$12 sps:$4 sm:$0xff]  }
  0xaa   : > { %v2969_v45 = vld [vmem:[#allocation4 + $0x138] ss:$12 sps:$4 sm:$0xff]   ;;  %v2972_v47 = vld [vmem:[#allocation4 + $0x150] ss:$12 sps:$4 sm:$0xff]   ;;  %v3023_v53 = vld [vmem:[#allocation4 + $0x188] ss:$12 sps:$4 sm:$0xff]  }
  0xab   : > { %v357_v48 = vld [vmem:[%s3612_s18] sm:$0xff]  ;;  %v2973_v52 = vld [vmem:[#allocation4 + $0x16c] ss:$12 sps:$4 sm:$0xff]   ;;  %v2981_v61 = vld [vmem:[#allocation4 + $0x19c] ss:$12 sps:$4 sm:$0xff]   ;;  %s3687_s27 = scalar_lea.vmem [#allocation9], %s2405_s17  }
  0xac   : > { %1388 = vmatpush1.bf16.msra.mxu0 %v2942_v9  ;;  %2623 = vmatpush3.bf16.msra.mxu1 %v2993_v27  ;;  %v3018_v49 = vld [vmem:[#allocation4 + $0xb0] ss:$12 sps:$4 sm:$0xff]   ;;  %v371_v54 = vpack.c.bf16 %v364_v51, %v357_v48  ;;  %v3027_v55 = vld [vmem:[#allocation4 + $0x260] ss:$12 sps:$4 sm:$0xff]   ;;  %v2975_v56 = vld [vmem:[#allocation4 + $0x168] ss:$12 sps:$4 sm:$0xff]  }
  0xad   : > { %1389 = vmatprep.subr.bf16.mxu0 %v2943_v10  ;;  %2624 = vmatprep.subr.bf16.mxu1 %v2997_v30  ;;  %v2978_v57 = vld [vmem:[#allocation4 + $0x184] ss:$12 sps:$4 sm:$0xff]   ;;  %v3028_v58 = vld [vmem:[#allocation4 + $0x1a0] ss:$12 sps:$4 sm:$0xff]   ;;  %v3042_v3 = vld [vmem:[#allocation4 + $0x2a8] ss:$12 sps:$4 sm:$0xff]  }
  0xae   : > { %v3032_v59 = vld [vmem:[#allocation4 + $0x278] ss:$12 sps:$4 sm:$0xff]   ;;  %v2976_v60 = vld [vmem:[#allocation4 + $0x180] ss:$12 sps:$4 sm:$0xff]   ;;  %v3037_v63 = vld [vmem:[#allocation4 + $0x290] ss:$12 sps:$4 sm:$0xff]  }
  0xaf   : > { %v3033_v62 = vld [vmem:[#allocation4 + $0x1b8] ss:$12 sps:$4 sm:$0xff]   ;;  %v2986_v1 = vld [vmem:[#allocation4 + $0x1b4] ss:$12 sps:$4 sm:$0xff]   ;;  %v3038_v2 = vld [vmem:[#allocation4 + $0x1d0] ss:$12 sps:$4 sm:$0xff]  }
  0xb0   : > { %1390 = vmatpush1.bf16.msra.mxu0 %v2945_v11  ;;  %2625 = vmatpush3.bf16.msra.mxu1 %v2998_v31  ;;  %v2979_v0 = vld [vmem:[#allocation4 + $0x198] ss:$12 sps:$4 sm:$0xff]   ;;  %v2984_v4 = vld [vmem:[#allocation4 + $0x1b0] ss:$12 sps:$4 sm:$0xff]   ;;  %v3043_v6 = vld [vmem:[#allocation4 + $0x1e8] ss:$12 sps:$4 sm:$0xff]  }
  0xb1   : > { %1391 = vmatprep.subr.bf16.mxu0 %v2946_v12  ;;  %2626 = vmatprep.subr.bf16.mxu1 %v3002_v33  ;;  %v2991_v5 = vld [vmem:[#allocation4 + $0x1cc] ss:$12 sps:$4 sm:$0xff]   ;;  %v367_v9 = vld [vmem:[%s3612_s18 + $0x50] sm:$0xff]  ;;  %p3764_p9 = scmp.ne.s32.totalorder %s3752_s12, 0 }
  0xb2   : > { %v3047_v7 = vld [vmem:[#allocation4 + $0x2c0] ss:$12 sps:$4 sm:$0xff]   ;;  %v2989_v10 = vld [vmem:[#allocation4 + $0x1c8] ss:$12 sps:$4 sm:$0xff]   ;;  %v2996_v12 = vld [vmem:[#allocation4 + $0x1e4] ss:$12 sps:$4 sm:$0xff]  }
  0xb3   : > { %v360_v8 = vld [vmem:[%s3612_s18 + $0x18] sm:$0xff]  ;;  %v3006_v20 = vld [vmem:[#allocation4 + $0x214] ss:$12 sps:$4 sm:$0xff]   ;;  %v3016_v31 = vld [vmem:[#allocation4 + $0x244] ss:$12 sps:$4 sm:$0xff]   ;;  %s2592_s19 = sshll.u32 (%p3764_p9), %s3448_s28, 1 }
  0xb4   : > { %1392 = vmatpush1.bf16.msra.mxu0 %v2948_v16  ;;  %2627 = vmatpush3.bf16.msra.mxu1 %v3003_v35  ;;  %v374_v11 = vpack.c.bf16 %v367_v9, %v360_v8  ;;  %v3048_v13 = vld [vmem:[#allocation4 + $0x200] ss:$12 sps:$4 sm:$0xff]   ;;  %v3052_v14 = vld [vmem:[#allocation4 + $0x2d8] ss:$12 sps:$4 sm:$0xff]   ;;  %v3001_v16 = vld [vmem:[#allocation4 + $0x1fc] ss:$12 sps:$4 sm:$0xff]  }
  0xb5   : > { %1393 = vmatprep.subr.bf16.mxu0 %v2949_v17  ;;  %2628 = vmatprep.subr.bf16.mxu1 %v3007_v36  ;;  %v2994_v15 = vld [vmem:[#allocation4 + $0x1e0] ss:$12 sps:$4 sm:$0xff]   ;;  %v3053_v17 = vld [vmem:[#allocation4 + $0x218] ss:$12 sps:$4 sm:$0xff]   ;;  %v3058_v22 = vld [vmem:[#allocation4 + $0x230] ss:$12 sps:$4 sm:$0xff]  }
  0xb6   : > { %v2999_v19 = vld [vmem:[#allocation4 + $0x1f8] ss:$12 sps:$4 sm:$0xff]   ;;  %v3063_v27 = vld [vmem:[#allocation4 + $0x308] ss:$12 sps:$4 sm:$0xff]   ;;  %v3088_v51 = vld [vmem:[#allocation4 + $0x380] ss:$12 sps:$4 sm:$0xff]  }
  0xb7   : > { %v359_v23 = vld [vmem:[%s3612_s18 + $0x10] sm:$0xff]  ;;  %v3011_v26 = vld [vmem:[#allocation4 + $0x22c] ss:$12 sps:$4 sm:$0xff]   ;;  %v3021_v35 = vld [vmem:[#allocation4 + $0x25c] ss:$12 sps:$4 sm:$0xff]   ;;  %s2610_s1 = sshll.u32 (%p3764_p9), %s3448_s28, 3 }
  0xb8   : > { %1394 = vmatpush1.bf16.msra.mxu0 %v2951_v18  ;;  %2629 = vmatpush3.bf16.msra.mxu1 %v3008_v39  ;;  %v3057_v18 = vld [vmem:[#allocation4 + $0x2f0] ss:$12 sps:$4 sm:$0xff]   ;;  %v3009_v30 = vld [vmem:[#allocation4 + $0x228] ss:$12 sps:$4 sm:$0xff]   ;;  %v3072_v33 = vld [vmem:[#allocation4 + $0x3f8] ss:$12 sps:$4 sm:$0xff]   ;;  %s3697_s16 = scalar_lea.vmem (%p3764_p9), %s3741_s7, %s2610_s1  }
  0xb9   : > { %1395 = vmatprep.subr.bf16.mxu0 %v2952_v21  ;;  %2630 = vmatprep.subr.bf16.mxu1 %v3012_v40  ;;  %v3004_v21 = vld [vmem:[#allocation4 + $0x210] ss:$12 sps:$4 sm:$0xff]   ;;  %v3073_v36 = vld [vmem:[#allocation4 + $0x338] ss:$12 sps:$4 sm:$0xff]   ;;  %v3026_v39 = vld [vmem:[#allocation4 + $0x274] ss:$12 sps:$4 sm:$0xff]  }
  0xba   : > { %v3078_v40 = vld [vmem:[#allocation4 + $0x350] ss:$12 sps:$4 sm:$0xff]   ;;  %s2138_s24 = ssub.s32 (%p3764_p9), 5, %s2592_s19 }
  0xbb   : > { %v3061_v8 = vld [vmem:[#allocation4 + $0x31c] ss:$12 sps:$4 sm:$0xff]   ;;  %p2139_p12 = scmp.lt.s32.totalorder (%p3764_p9), %s2138_s24, 2 }
  0xbc   : > { %1396 = vmatpush1.bf16.msra.mxu0 %v2954_v24  ;;  %2631 = vmatpush3.bf16.msra.mxu1 %v3013_v43  ;;  %v3062_v24 = vld [vmem:[#allocation4 + $0x3c8] ss:$12 sps:$4 sm:$0xff]   ;;  %v3031_v43 = vld [vmem:[#allocation4 + $0x28c] ss:$12 sps:$4 sm:$0xff]  }
  0xbd   : > { %1397 = vmatprep.subr.bf16.mxu0 %v2955_v25  ;;  %2632 = vmatprep.subr.bf16.mxu1 %v3017_v44  ;;  %v366_v25 = vld [vmem:[%s3612_s18 + $0x48] sm:$0xff] }
  0xbe   : > { %v3083_v44 = vld [vmem:[#allocation4 + $0x368] ss:$12 sps:$4 sm:$0xff]  }
  0xc0   : > { %1398 = vmatpush1.bf16.msra.mxu0 %v2957_v28  ;;  %2633 = vmatpush3.bf16.msra.mxu1 %v3018_v49  ;;  %v3634_v28 = vpack.c.bf16 %v366_v25, %v359_v23  ;;  %v3029_v49 = vld [vmem:[#allocation4 + $0x288] ss:$12 sps:$4 sm:$0xff]   ;;  %v3096_v23 = vld [vmem:[#allocation4 + $0x3c4] ss:$12 sps:$4 sm:$0xff]  }
  0xc1   : > { %1399 = vmatprep.subr.bf16.mxu0 %v2958_v29  ;;  %2640 = vmatprep.subr.bf16.mxu1 %v3022_v50  ;;  %v3067_v29 = vld [vmem:[#allocation4 + $0x3e0] ss:$12 sps:$4 sm:$0xff]   ;;  %v3036_v50 = vld [vmem:[#allocation4 + $0x2a4] ss:$12 sps:$4 sm:$0xff]   ;;  %v3101_v25 = vld [vmem:[#allocation4 + $0x3dc] ss:$12 sps:$4 sm:$0xff]  }
  0xc3   : > { %1584 = vmatmul.mubr.bf16.vlgmr.msra.gmra.mrb[0].mxu1 %v371_v54 }
  0xc4   : > { %1400 = vmatpush1.bf16.msra.mxu0 %v2960_v32  ;;  %2641 = vmatpush3.bf16.msra.mxu1 %v3023_v53  ;;  %v3068_v32 = vld [vmem:[#allocation4 + $0x320] ss:$12 sps:$4 sm:$0xff]  }
  0xc5   : > { %1401 = vmatprep.subr.bf16.mxu0 %v2961_v34  ;;  %2642 = vmatprep.subr.bf16.mxu1 %v3027_v55  ;;  %v3014_v34 = vld [vmem:[#allocation4 + $0x240] ss:$12 sps:$4 sm:$0xff]   ;;  %v3093_v55 = vld [vmem:[#allocation4 + $0x398] ss:$12 sps:$4 sm:$0xff]  }
  0xc6   : > { %1624 = vmatprep.mubr.bf16.mxu1 %v374_v11  ;;  %v3034_v53 = vld [vmem:[#allocation4 + $0x2a0] ss:$12 sps:$4 sm:$0xff]  }
  0xc8   : > { %1402 = vmatpush1.bf16.msra.mxu0 %v2963_v37  ;;  %2643 = vmatpush3.bf16.msra.mxu1 %v3028_v58  ;;  %v3077_v37 = vld [vmem:[#allocation4 + $0x410] ss:$12 sps:$4 sm:$0xff]   ;;  %v3046_v58 = vld [vmem:[#allocation4 + $0x2d4] ss:$12 sps:$4 sm:$0xff]  }
  0xc9   : > { %1403 = vmatprep.subr.bf16.mxu0 %v2964_v38  ;;  %2644 = vmatprep.subr.bf16.mxu1 %v3032_v59  ;;  %v3019_v38 = vld [vmem:[#allocation4 + $0x258] ss:$12 sps:$4 sm:$0xff]   ;;  %v3098_v59 = vld [vmem:[#allocation4 + $0x3b0] ss:$12 sps:$4 sm:$0xff]  }
  0xcc   : > { %1404 = vmatpush1.bf16.msra.mxu0 %v2966_v41  ;;  %2645 = vmatpush3.bf16.msra.mxu1 %v3033_v62  ;;  %v3082_v41 = vld [vmem:[#allocation4 + $0x428] ss:$12 sps:$4 sm:$0xff]   ;;  %v3044_v62 = vld [vmem:[#allocation4 + $0x2d0] ss:$12 sps:$4 sm:$0xff]  }
  0xcd   : > { %1405 = vmatprep.subr.bf16.mxu0 %v2967_v42  ;;  %2646 = vmatprep.subr.bf16.mxu1 %v3037_v63  ;;  %v3024_v42 = vld [vmem:[#allocation4 + $0x270] ss:$12 sps:$4 sm:$0xff]   ;;  %v3051_v63 = vld [vmem:[#allocation4 + $0x2ec] ss:$12 sps:$4 sm:$0xff]  }
  0xd0   : > { %1406 = vmatpush1.bf16.msra.mxu0 %v2969_v45  ;;  %2647 = vmatpush3.bf16.msra.mxu1 %v3038_v2  ;;  %v362_v45 = vld [vmem:[%s3612_s18 + $0x28] sm:$0xff] }
  0xd1   : > { %1407 = vmatprep.subr.bf16.mxu0 %v2970_v46  ;;  %2648 = vmatprep.subr.bf16.mxu1 %v3042_v3  ;;  %v369_v46 = vld [vmem:[%s3612_s18 + $0x60] sm:$0xff] }
  0xd2   : > { %v376_v48 = vpack.c.bf16 %v369_v46, %v362_v45  ;;  %v3049_v2 = vld [vmem:[#allocation4 + $0x2e8] ss:$12 sps:$4 sm:$0xff]   ;;  %v3056_v3 = vld [vmem:[#allocation4 + $0x304] ss:$12 sps:$4 sm:$0xff]  }
  0xd3   : > { %v3127_v45 = vld [vmem:[#allocation6 + $0x8] sm:$0xff]   ;;  %v3128_v46 = vld [vmem:[#allocation6 + $0x50] sm:$0xff]  }
  0xd4   : > { %1408 = vmatpush1.bf16.msra.mxu0 %v2972_v47  ;;  %2649 = vmatpush3.bf16.msra.mxu1 %v3043_v6  ;;  %v3087_v47 = vld [vmem:[#allocation4 + $0x440] ss:$12 sps:$4 sm:$0xff]  }
  0xd5   : > { %1409 = vmatprep.subr.bf16.mxu0 %v2973_v52  ;;  %2650 = vmatprep.subr.bf16.mxu1 %v3047_v7  ;;  %v3092_v52 = vld [vmem:[#allocation4 + $0x458] ss:$12 sps:$4 sm:$0xff]   ;;  %v3054_v7 = vld [vmem:[#allocation4 + $0x300] ss:$12 sps:$4 sm:$0xff]  }
  0xd6   : > { %v370_v6 = vld [vmem:[%s3612_s18 + $0x68] sm:$0xff] }
  0xd8   : > { %1410 = vmatpush1.bf16.msra.mxu0 %v2975_v56  ;;  %2651 = vmatpush3.bf16.msra.mxu1 %v3048_v13  ;;  %v3039_v56 = vld [vmem:[#allocation4 + $0x2b8] ss:$12 sps:$4 sm:$0xff]  }
  0xd9   : > { %1422 = vmatprep.subr.bf16.mxu0 %v2978_v57  ;;  %2652 = vmatprep.subr.bf16.mxu1 %v3052_v14  ;;  %v3097_v57 = vld [vmem:[#allocation4 + $0x470] ss:$12 sps:$4 sm:$0xff]   ;;  %v3071_v13 = vld [vmem:[#allocation4 + $0x34c] ss:$12 sps:$4 sm:$0xff]   ;;  %v3069_v14 = vld [vmem:[#allocation4 + $0x348] ss:$12 sps:$4 sm:$0xff]  }
  0xdb   : > { %1412 = vmatmul.mubr.bf16.vlgmr.msra.gmra.mrb[0].mxu0 %v371_v54  ;;  %v3041_v54 = vld [vmem:[#allocation4 + $0x2bc] ss:$12 sps:$4 sm:$0xff]  }
  0xdc   : > { %1423 = vmatpush1.bf16.msra.mxu0 %v2976_v60  ;;  %1454 = vmatprep.mubr.bf16.mxu0 %v374_v11  ;;  %v361_v60 = vld [vmem:[%s3612_s18 + $0x20] sm:$0xff] }
  0xdd   : > { %1424 = vmatprep.subr.bf16.mxu0 %v2981_v61  ;;  %2653 = vmatpush3.bf16.msra.mxu1 %v3053_v17  ;;  %v368_v61 = vld [vmem:[%s3612_s18 + $0x58] sm:$0xff]  ;;  %v3066_v11 = vld [vmem:[#allocation4 + $0x334] ss:$12 sps:$4 sm:$0xff]  }
  0xde   : > { %2654 = vmatprep.subr.bf16.mxu1 %v3057_v18  ;;  %v3081_v17 = vld [vmem:[#allocation4 + $0x37c] ss:$12 sps:$4 sm:$0xff]   ;;  %v3079_v18 = vld [vmem:[#allocation4 + $0x378] ss:$12 sps:$4 sm:$0xff]  }
  0xe0   : > { %1425 = vmatpush1.bf16.msra.mxu0 %v2979_v0  ;;  %v3105_v0 = vld [vmem:[#allocation4 + $0x488] ss:$12 sps:$4 sm:$0xff]  }
  0xe1   : > { %1426 = vmatprep.subr.bf16.mxu0 %v2986_v1  ;;  %2655 = vmatpush3.bf16.msra.mxu1 %v3058_v22  ;;  %v3641_v1 = vpack.c.bf16 %v368_v61, %v361_v60  ;;  %v3089_v22 = vld [vmem:[#allocation4 + $0x3a8] ss:$12 sps:$4 sm:$0xff]   ;;  %v576_v60 = vlaneseq }
  0xe2   : > { %2662 = vmatprep.subr.bf16.mxu1 %v3062_v24  ;;  %v3094_v24 = vld [vmem:[#allocation4 + $0x3c0] ss:$12 sps:$4 sm:$0xff]  }
  0xe3   : > { %v3136_v61 = vld [vmem:[#allocation6 + $0x70] sm:$0xff]  }
  0xe4   : > { %1427 = vmatpush1.bf16.msra.mxu0 %v2984_v4  ;;  %1625 = vmatmul.mubr.bf16.vlgmr.msra.gmra.mrb[4].mxu1 %v3634_v28  ;;  %v3386_v4 = vmov 0.0  }
  0xe5   : > { %1428 = vmatprep.subr.bf16.mxu0 %v2991_v5  ;;  %2663 = vmatpush3.bf16.msra.mxu1 %v3063_v27  ;;  %v363_v5 = vld [vmem:[%s3612_s18 + $0x30] sm:$0xff] }
  0xe6   : > { %2664 = vmatprep.subr.bf16.mxu1 %v3067_v29  ;;  %1665 = vmatprep.mubr.bf16.mxu1 %v376_v48  ;;  %v3649_v9 = vpack.c.bf16 %v370_v6, %v363_v5  ;;  %v3104_v27 = vld [vmem:[#allocation4 + $0x3f4] ss:$12 sps:$4 sm:$0xff]   ;;  %v3108_v29 = vld [vmem:[#allocation4 + $0x40c] ss:$12 sps:$4 sm:$0xff]  }
  0xe8   : > { %1429 = vmatpush1.bf16.msra.mxu0 %v2989_v10  ;;  %v3059_v10 = vld [vmem:[#allocation4 + $0x318] ss:$12 sps:$4 sm:$0xff]  }
  0xe9   : > { %1430 = vmatprep.subr.bf16.mxu0 %v2996_v12  ;;  %2665 = vmatpush3.bf16.msra.mxu1 %v3068_v32  ;;  %v3064_v12 = vld [vmem:[#allocation4 + $0x330] ss:$12 sps:$4 sm:$0xff]   ;;  %v3109_v32 = vld [vmem:[#allocation4 + $0x420] ss:$12 sps:$4 sm:$0xff]  }
  0xea   : > { %2666 = vmatprep.subr.bf16.mxu1 %v3072_v33  ;;  %v3114_v33 = vld [vmem:[#allocation4 + $0x43c] ss:$12 sps:$4 sm:$0xff]  }
  0xec   : > { %1431 = vmatpush1.bf16.msra.mxu0 %v2994_v15  ;;  %v3076_v15 = vld [vmem:[#allocation4 + $0x364] ss:$12 sps:$4 sm:$0xff]  }
  0xed   : > { %1432 = vmatprep.subr.bf16.mxu0 %v3001_v16  ;;  %2667 = vmatpush3.bf16.msra.mxu1 %v3073_v36  ;;  %v3074_v16 = vld [vmem:[#allocation4 + $0x360] ss:$12 sps:$4 sm:$0xff]   ;;  %v3115_v36 = vld [vmem:[#allocation4 + $0x450] ss:$12 sps:$4 sm:$0xff]  }
  0xee   : > { %2668 = vmatprep.subr.bf16.mxu1 %v3077_v37  ;;  %v3120_v37 = vld [vmem:[#allocation4 + $0x46c] ss:$12 sps:$4 sm:$0xff]  }
  0xf0   : > { %1433 = vmatpush1.bf16.msra.mxu0 %v2999_v19  ;;  %v3086_v19 = vld [vmem:[#allocation4 + $0x394] ss:$12 sps:$4 sm:$0xff]  }
  0xf1   : > { %1434 = vmatprep.subr.bf16.mxu0 %v3006_v20  ;;  %2669 = vmatpush3.bf16.msra.mxu1 %v3078_v40  ;;  %v3084_v20 = vld [vmem:[#allocation4 + $0x390] ss:$12 sps:$4 sm:$0xff]   ;;  %v3121_v40 = vld [vmem:[#allocation4 + $0x480] ss:$12 sps:$4 sm:$0xff]  }
  0xf2   : > { %2670 = vmatprep.subr.bf16.mxu1 %v3082_v41  ;;  %v3388_v41 = vmov 0  }
  0xf4   : > { %1435 = vmatpush1.bf16.msra.mxu0 %v3004_v21  ;;  %v3091_v21 = vld [vmem:[#allocation4 + $0x3ac] ss:$12 sps:$4 sm:$0xff]  }
  0xf5   : > { %1436 = vmatprep.subr.bf16.mxu0 %v3011_v26  ;;  %2671 = vmatpush3.bf16.msra.mxu1 %v3083_v44  ;;  %v3099_v26 = vld [vmem:[#allocation4 + $0x3d8] ss:$12 sps:$4 sm:$0xff]  }
  0xf6   : > { %2672 = vmatprep.subr.bf16.mxu1 %v3087_v47  ;;  %v3126_v44 = vld [vmem:[#allocation6 + $0x48] sm:$0xff]   ;;  %v3129_v47 = vld [vmem:[#allocation6 + $0x10] sm:$0xff]  }
  0xf8   : > { %1437 = vmatpush1.bf16.msra.mxu0 %v3009_v30  ;;  %v3106_v30 = vld [vmem:[#allocation4 + $0x408] ss:$12 sps:$4 sm:$0xff]  }
  0xf9   : > { %1438 = vmatprep.subr.bf16.mxu0 %v3016_v31  ;;  %2673 = vmatpush3.bf16.msra.mxu1 %v3088_v51  ;;  %v3111_v31 = vld [vmem:[#allocation4 + $0x424] ss:$12 sps:$4 sm:$0xff]   ;;  %v3133_v51 = vld [vmem:[#allocation6 + $0x20] sm:$0xff]  }
  0xfa   : > { %2674 = vmatprep.subr.bf16.mxu1 %v3092_v52  ;;  %v3134_v52 = vld [vmem:[#allocation6 + $0x68] sm:$0xff]  }
  0xfc   : > { %1439 = vmatpush1.bf16.msra.mxu0 %v3014_v34  ;;  %v3112_v34 = vld [vmem:[#allocation4 + $0x438] ss:$12 sps:$4 sm:$0xff]  }
  0xfd   : > { %1440 = vmatprep.subr.bf16.mxu0 %v3021_v35  ;;  %2675 = vmatpush3.bf16.msra.mxu1 %v3093_v55  ;;  %v3117_v35 = vld [vmem:[#allocation4 + $0x454] ss:$12 sps:$4 sm:$0xff]  }
  0xfe   : > { %2676 = vmatprep.subr.bf16.mxu1 %v3097_v57 }
 0x100   : > { %1441 = vmatpush1.bf16.msra.mxu0 %v3019_v38  ;;  %v3118_v38 = vld [vmem:[#allocation4 + $0x468] ss:$12 sps:$4 sm:$0xff]  }
 0x101   : > { %1442 = vmatprep.subr.bf16.mxu0 %v3026_v39  ;;  %2677 = vmatpush3.bf16.msra.mxu1 %v3098_v59  ;;  %v3123_v39 = vld [vmem:[#allocation4 + $0x484] ss:$12 sps:$4 sm:$0xff]  }
 0x102   : > { %2726 = vmatprep.subr.bf16.mxu1 %v3386_v4 }
 0x104   : > { %1443 = vmatpush1.bf16.msra.mxu0 %v3024_v42  ;;  %1666 = vmatmul.mubr.bf16.vlgmr.msra.gmra.mrb[8].mxu1 %v3641_v1  ;;  %v3124_v42 = vld [vmem:[#allocation6 + $0x40] sm:$0xff]  }
 0x105   : > { %1444 = vmatprep.subr.bf16.mxu0 %v3031_v43  ;;  %2727 = vmatpush3.bf16.msra.mxu1 %v3105_v0  ;;  %v3125_v43 = vld [vmem:[#allocation6] sm:$0xff]   ;;  %v3138_v0 = vld [vmem:[#allocation6 + $0x78] sm:$0xff]  }
 0x106   : > { %2728 = vmatprep.mubr.msk.bf16.mxu1 %vm3387_vm1, %v3386_v4  ;;  %2686 = vmatprep.subr.bf16.mxu1 %v3124_v42 }
 0x108   : > { %1445 = vmatpush1.bf16.msra.mxu0 %v3029_v49  ;;  %v3131_v49 = vld [vmem:[#allocation6 + $0x18] sm:$0xff]  }
 0x109   : > { %1446 = vmatprep.subr.bf16.mxu0 %v3036_v50  ;;  %v3132_v50 = vld [vmem:[#allocation6 + $0x60] sm:$0xff]  }
 0x10c   : > { %1447 = vmatpush1.bf16.msra.mxu0 %v3034_v53  ;;  %2729 = vmatmul.mubr.msk.bf16.vlgmr.msra.gmra.mrb[12].mxu1 %vm1375_vm0, %v3649_v9  ;;  %v3135_v53 = vld [vmem:[#allocation6 + $0x28] sm:$0xff]  }
 0x10d   : > { %1448 = vmatprep.subr.bf16.mxu0 %v3041_v54  ;;  %2687 = vmatpush3.bf16.msra.mxu1 %v3125_v43 }
 0x10e   : > { %2688 = vmatprep.subr.bf16.mxu1 %v3126_v44 }
 0x110   : > { %1449 = vmatpush1.bf16.msra.mxu0 %v3039_v56 }
 0x111   : > { %1450 = vmatprep.subr.bf16.mxu0 %v3046_v58  ;;  %2689 = vmatpush3.bf16.msra.mxu1 %v3127_v45 }
 0x112   : > { %2690 = vmatprep.subr.bf16.mxu1 %v3128_v46 }
 0x114   : > { %1451 = vmatpush1.bf16.msra.mxu0 %v3044_v62  ;;  %v3137_v62 = vld [vmem:[#allocation6 + $0x30] sm:$0xff]  }
 0x115   : > { %1452 = vmatprep.subr.bf16.mxu0 %v3051_v63  ;;  %2691 = vmatpush3.bf16.msra.mxu1 %v3129_v47  ;;  %v577_v63 = vshrl.u32 %v576_v60, 7  ;;  %v3149_v60 = vld [vmem:[#allocation7 + $0x8] sm:$0xff]  }
 0x118   : > { %1453 = vmatpush1.bf16.msra.mxu0 %v3049_v2  ;;  %v586_v2 = vsub.s32 2, %v577_v63 }
 0x119   : > { %1465 = vmatprep.subr.bf16.mxu0 %v3056_v3  ;;  %v574_v3 = vld [vmem:[%s3736_s2] sm:$0x7] }
 0x11a   : > { %v587_v5 = vrot.slane %v574_v3, %v586_v2  ;;  %v3155_v2 = vld [vmem:[#allocation7 + $0x38] sm:$0xff]  }
 0x11b   : > { %1455 = vmatmul.mubr.bf16.vlgmr.msra.gmra.mrb[0].mxu0 %v3634_v28  ;;  %v3102_v28 = vld [vmem:[#allocation4 + $0x3f0] ss:$12 sps:$4 sm:$0xff]  }
 0x11c   : > { %1466 = vmatpush1.bf16.msra.mxu0 %v3054_v7  ;;  %1497 = vmatprep.mubr.bf16.mxu0 %v376_v48  ;;  %v3130_v48 = vld [vmem:[#allocation6 + $0x58] sm:$0xff]  }
 0x11d   : > { %1467 = vmatprep.subr.bf16.mxu0 %v3061_v8  ;;  %2692 = vmatprep.subr.bf16.mxu1 %v3130_v48 }
 0x11e   : > { %2693 = vmatpush3.bf16.msra.mxu1 %v3131_v49 }
 0x11f   : > { %2694 = vmatprep.subr.bf16.mxu1 %v3132_v50 }
 0x120   : > { %1468 = vmatpush1.bf16.msra.mxu0 %v3059_v10 }
 0x121   : > { %1469 = vmatprep.subr.bf16.mxu0 %v3066_v11 }
 0x122   : > { %2695 = vmatpush3.bf16.msra.mxu1 %v3133_v51  ;;  %v3140_v51 = vld [vmem:[#allocation6 + $0x80] sm:$0xff]  }
 0x123   : > { %2696 = vmatprep.subr.bf16.mxu1 %v3134_v52  ;;  %v3141_v52 = vld [vmem:[#allocation6 + $0x88] sm:$0xff]  }
 0x124   : > { %1470 = vmatpush1.bf16.msra.mxu0 %v3064_v12 }
 0x125   : > { %1471 = vmatprep.subr.bf16.mxu0 %v3071_v13 }
 0x126   : > { %2697 = vmatpush3.bf16.msra.mxu1 %v3135_v53  ;;  %v3142_v53 = vld [vmem:[#allocation6 + $0x90] sm:$0xff]  }
 0x127   : > { %2698 = vmatprep.subr.bf16.mxu1 %v3136_v61  ;;  %v3150_v61 = vld [vmem:[#allocation7 + $0x10] sm:$0xff]  }
 0x128   : > { %1472 = vmatpush1.bf16.msra.mxu0 %v3069_v14 }
 0x129   : > { %1473 = vmatprep.subr.bf16.mxu0 %v3076_v15 }
 0x12a   : > { %2699 = vmatpush3.bf16.msra.mxu1 %v3137_v62  ;;  %v3151_v62 = vld [vmem:[#allocation7 + $0x18] sm:$0xff]  }
 0x12b   : > { %2700 = vmatprep.subr.bf16.mxu1 %v3138_v0  ;;  %v3153_v0 = vld [vmem:[#allocation7 + $0x28] sm:$0xff]  }
 0x12c   : > { %1474 = vmatpush1.bf16.msra.mxu0 %v3074_v16 }
 0x12d   : > { %1475 = vmatprep.subr.bf16.mxu0 %v3081_v17 }
 0x130   : > { %1476 = vmatpush1.bf16.msra.mxu0 %v3079_v18 }
 0x131   : > { %1477 = vmatprep.subr.bf16.mxu0 %v3086_v19 }
 0x134   : > { %1478 = vmatpush1.bf16.msra.mxu0 %v3084_v20 }
 0x135   : > { %1479 = vmatprep.subr.bf16.mxu0 %v3091_v21 }
 0x138   : > { %1480 = vmatpush1.bf16.msra.mxu0 %v3089_v22 }
 0x139   : > { %1481 = vmatprep.subr.bf16.mxu0 %v3096_v23 }
 0x13c   : > { %1482 = vmatpush1.bf16.msra.mxu0 %v3094_v24 }
 0x13d   : > { %1483 = vmatprep.subr.bf16.mxu0 %v3101_v25 }
 0x140   : > { %1484 = vmatpush1.bf16.msra.mxu0 %v3099_v26 }
 0x141   : > { %1485 = vmatprep.subr.bf16.mxu0 %v3104_v27 }
 0x144   : > { %1486 = vmatpush1.bf16.msra.mxu0 %v3102_v28 }
 0x145   : > { %1487 = vmatprep.subr.bf16.mxu0 %v3108_v29 }
 0x148   : > { %1488 = vmatpush1.bf16.msra.mxu0 %v3106_v30 }
 0x149   : > { %1489 = vmatprep.subr.bf16.mxu0 %v3111_v31 }
 0x14c   : > { %1490 = vmatpush1.bf16.msra.mxu0 %v3109_v32 }
 0x14d   : > { %1491 = vmatprep.subr.bf16.mxu0 %v3114_v33  ;;  %v578_v33 = vsub.s32 0, %v577_v63 }
 0x150   : > { %1492 = vmatpush1.bf16.msra.mxu0 %v3112_v34  ;;  %v582_v34 = vsub.s32 1, %v577_v63  ;;  %v3152_v63 = vld [vmem:[#allocation7 + $0x20] sm:$0xff]  }
 0x151   : > { %1493 = vmatprep.subr.bf16.mxu0 %v3117_v35  ;;  %v579_v35 = vrot.slane %v574_v3, %v578_v33 }
 0x154   : > { %1494 = vmatpush1.bf16.msra.mxu0 %v3115_v36  ;;  %v583_v36 = vrot.slane %v574_v3, %v582_v34 }
 0x155   : > { %1495 = vmatprep.subr.bf16.mxu0 %v3120_v37 }
 0x158   : > { %1496 = vmatpush1.bf16.msra.mxu0 %v3118_v38 }
 0x159   : > { %1508 = vmatprep.subr.bf16.mxu0 %v3123_v39 }
 0x15b   : > { %1498 = vmatmul.mubr.bf16.vlgmr.msra.gmra.mrb[0].mxu0 %v3641_v1  ;;  %v3139_v1 = vld [vmem:[#allocation6 + $0x38] sm:$0xff]  }
 0x15c   : > { %1509 = vmatpush1.bf16.msra.mxu0 %v3121_v40  ;;  %1540 = vmatprep.mubr.bf16.mxu0 %v3388_v41 }
 0x15d   : > { %2701 = vmatpush3.bf16.msra.mxu1 %v3139_v1  ;;  %v3154_v1 = vld [vmem:[#allocation7 + $0x30] sm:$0xff]  }
 0x15e   : > { %2732 = vmatprep.subr.bf16.mxu1 %v3386_v4 }
 0x167   : > { %2553 = vmatmul.mubr.msk.bf16.vlgmr.msra.gmra.mrb[0].mxu0 %vm1375_vm0, %v3649_v9 }
 0x196   : > { %v2634_v54 = vpop.f32.mrb[0].mxu1 }
 0x197   : > { %v2635_v55 = vpop.f32.mrb[1].mxu1 }
 0x198   : > { %v2636_v56 = vadd.f32 %v2635_v55, %v2634_v54  ;;  %v2637_v57 = vpop.f32.mrb[2].mxu1  ;;  %v3143_v54 = vld [vmem:[#allocation6 + $0x98] sm:$0xff]   ;;  %v3144_v55 = vld [vmem:[#allocation6 + $0xa0] sm:$0xff]  }
 0x199   : > { %v2638_v58 = vpop.f32.mrb[3].mxu1 }
 0x19a   : > { %v2639_v59 = vadd.f32 %v2638_v58, %v2637_v57  ;;  %v1586_v6 = vadd.f32 %v2636_v56, %v587_v5  ;;  %v3145_v56 = vld [vmem:[#allocation6 + $0xa8] sm:$0xff]   ;;  %v3146_v57 = vld [vmem:[#allocation6 + $0xb0] sm:$0xff]   ;;  %v3147_v58 = vld [vmem:[#allocation6 + $0xb8] sm:$0xff]  }
 0x19c   : > { %v1589_v9 = vadd.f32 %v2639_v59, %v587_v5  ;;  %v3148_v59 = vld [vmem:[#allocation7] sm:$0xff]  }
 0x1b7   : > { %v2656_v7 = vpop.f32.mrb[4].mxu1 }
 0x1b8   : > { %v2657_v8 = vpop.f32.mrb[5].mxu1 }
 0x1b9   : > { %v2658_v10 = vadd.f32 %v2657_v8, %v2656_v7  ;;  %v2659_v11 = vpop.f32.mrb[6].mxu1 }
 0x1ba   : > { %v2660_v12 = vpop.f32.mrb[7].mxu1 }
 0x1bb   : > { %v1627_v13 = vadd.f32 %v2658_v10, %v1586_v6  ;;  %v2661_v14 = vadd.f32 %v2660_v12, %v2659_v11  ;;  %v2555_v10 = vld [vmem:[%s3738_s4] ss:$0 sm:$0xff] }
 0x1bd   : > { %v1630_v15 = vadd.f32 %v2661_v14, %v1589_v9 }
 0x1d7   : > { %v2678_v16 = vpop.f32.mrb[8].mxu1 }
 0x1d8   : > { %v2679_v17 = vpop.f32.mrb[9].mxu1 }
 0x1d9   : > { %v2680_v18 = vadd.f32 %v2679_v17, %v2678_v16  ;;  %v2681_v19 = vpop.f32.mrb[10].mxu1 }
 0x1da   : > { %v2682_v20 = vpop.f32.mrb[11].mxu1 }
 0x1db   : > { %v2683_v21 = vadd.f32 %v2682_v20, %v2681_v19  ;;  %v1668_v22 = vadd.f32 %v2680_v18, %v1627_v13 }
 0x1dd   : > { %v1671_v23 = vadd.f32 %v2683_v21, %v1630_v15  ;;  %v2580_v21 = vld [vmem:[%s3740_s6] ss:$0 sm:$0xff] }
 0x1df   : > { %v1708_v24 = vpop.f32.mrb[12].mxu1 }
 0x1e0   : > { %v1709_v25 = vadd.f32 %v1708_v24, %v1668_v22  ;;  %v2730_v26 = vpop.f32.mrb[13].mxu1 }
 0x1e1   : > { %v1711_v27 = vpop.f32.mrb[14].mxu1 }
 0x1e2   : > { %v1717_v28 = vmax.f32 %v1709_v25, 0.0  ;;  %v1712_v29 = vadd.f32 %v1711_v27, %v1671_v23  ;;  %v2731_v30 = vpop.f32.mrb[15].mxu1 }
 0x1e4   : > { %v1720_v31 = vmax.f32 %v1712_v29, 0.0 }
 0x1e6   : > { %v1723_v32 = vpack.c.bf16 %v1720_v31, %v1717_v28 }
 0x23a   : > { %v1542_v37 = vpop.f32.mrb[0].mxu0 }
 0x23b   : > { %v2772_v38 = vadd.f32 %v1542_v37, %v579_v35  ;;  %v1544_v39 = vpop.f32.mrb[1].mxu0 }
 0x23c   : > { %v2773_v40 = vadd.f32 %v1544_v39, %v583_v36  ;;  %v1546_v41 = vpop.f32.mrb[2].mxu0 }
 0x23d   : > { %v2774_v42 = vadd.f32 %v1546_v41, %v579_v35  ;;  %v1548_v43 = vpop.f32.mrb[3].mxu0  ;;  %v1715_v45 = vmax.f32 %v2772_v38, 0.0 }
 0x23e   : > { %v2775_v44 = vadd.f32 %v1548_v43, %v583_v36  ;;  %v1716_v47 = vmax.f32 %v2773_v40, 0.0 }
 0x23f   : > { %v1718_v46 = vmax.f32 %v2774_v42, 0.0 }
 0x240   : > { %v1719_v48 = vmax.f32 %v2775_v44, 0.0 }
 0x241   : > { %v1721_v49 = vpack.c.bf16 %v1718_v46, %v1715_v45 }
 0x242   : > { %v1722_v50 = vpack.c.bf16 %v1719_v48, %v1716_v47 }
 0x244   : > { %1955 = vmatprep.mubr.bf16.mxu1 %v1722_v50 }
 0x245   : > { %1956 = vmatmul.mubr.bf16.vlgmr.msra.gmra.mrb[16].mxu1 %v1721_v49 }
 0x246   : > { %2733 = vmatpush3.bf16.msra.mxu1 %v3140_v51  ;;  %2748 = vmatprep.mubr.msk.bf16.mxu1 %vm3387_vm1, %v3386_v4 }
 0x247   : > { %2734 = vmatprep.subr.bf16.mxu1 %v3386_v4 }
 0x24a   : > { %2735 = vmatpush3.bf16.msra.mxu1 %v3141_v52 }
 0x24b   : > { %2736 = vmatprep.subr.bf16.mxu1 %v3386_v4 }
 0x24e   : > { %2737 = vmatpush3.bf16.msra.mxu1 %v3142_v53 }
 0x24f   : > { %2738 = vmatprep.subr.bf16.mxu1 %v3386_v4 }
 0x252   : > { %2739 = vmatpush3.bf16.msra.mxu1 %v3143_v54 }
 0x253   : > { %2740 = vmatprep.subr.bf16.mxu1 %v3386_v4 }
 0x256   : > { %2741 = vmatpush3.bf16.msra.mxu1 %v3144_v55 }
 0x257   : > { %2742 = vmatprep.subr.bf16.mxu1 %v3386_v4 }
 0x25a   : > { %2743 = vmatpush3.bf16.msra.mxu1 %v3145_v56 }
 0x25b   : > { %2744 = vmatprep.subr.bf16.mxu1 %v3386_v4 }
 0x25e   : > { %2745 = vmatpush3.bf16.msra.mxu1 %v3146_v57 }
 0x25f   : > { %2746 = vmatprep.subr.bf16.mxu1 %v3386_v4 }
 0x262   : > { %2747 = vmatpush3.bf16.msra.mxu1 %v3147_v58 }
 0x263   : > { %2752 = vmatprep.subr.bf16.mxu1 %v3386_v4 }
 0x265   : > { %2749 = vmatmul.mubr.bf16.vlgmr.msra.gmra.mrb[20].mxu1 %v1723_v32 }
 0x266   : > { %2768 = vmatprep.mubr.msk.bf16.mxu1 %vm3387_vm1, %v3386_v4  ;;  %2753 = vmatpush3.bf16.msra.mxu1 %v3148_v59 }
 0x267   : > { %2754 = vmatprep.subr.bf16.mxu1 %v3386_v4 }
 0x26a   : > { %2755 = vmatpush3.bf16.msra.mxu1 %v3149_v60 }
 0x26b   : > { %2756 = vmatprep.subr.bf16.mxu1 %v3386_v4 }
 0x26e   : > { %2757 = vmatpush3.bf16.msra.mxu1 %v3150_v61 }
 0x26f   : > { %2758 = vmatprep.subr.bf16.mxu1 %v3386_v4 }
 0x272   : > { %2759 = vmatpush3.bf16.msra.mxu1 %v3151_v62 }
 0x273   : > { %2760 = vmatprep.subr.bf16.mxu1 %v3386_v4 }
 0x276   : > { %2761 = vmatpush3.bf16.msra.mxu1 %v3152_v63 }
 0x277   : > { %2762 = vmatprep.subr.bf16.mxu1 %v3386_v4 }
 0x27a   : > { %2763 = vmatpush3.bf16.msra.mxu1 %v3153_v0 }
 0x27b   : > { %2764 = vmatprep.subr.bf16.mxu1 %v3386_v4 }
 0x27e   : > { %2765 = vmatpush3.bf16.msra.mxu1 %v3154_v1 }
 0x27f   : > { %2766 = vmatprep.subr.bf16.mxu1 %v3386_v4 }
 0x282   : > { %2767 = vmatpush3.bf16.msra.mxu1 %v3155_v2 }
 0x318   : > { %v2702_v3 = vpop.f32.mrb[16].mxu1 }
 0x319   : > { %v2703_v5 = vpop.f32.mrb[17].mxu1 }
 0x31a   : > { %v2704_v6 = vadd.f32 %v2703_v5, %v2702_v3  ;;  %v2705_v7 = vpop.f32.mrb[18].mxu1 }
 0x31b   : > { %v2706_v8 = vpop.f32.mrb[19].mxu1 }
 0x31c   : > { %v2707_v9 = vadd.f32 %v2706_v8, %v2705_v7  ;;  %v1958_v11 = vadd.f32 %v2704_v6, %v2555_v10 }
 0x31e   : > { %v1961_v15 = vadd.f32 %v2707_v9, %v2555_v10 }
 0x338   : > { %v1998_v12 = vpop.f32.mrb[20].mxu1 }
 0x339   : > { %v1999_v13 = vadd.f32 %v1998_v12, %v1958_v11  ;;  %v2750_v14 = vpop.f32.mrb[21].mxu1 }
 0x33a   : > { %v2001_v16 = vpop.f32.mrb[22].mxu1 }
 0x33b   : > { %v2002_v4 = vadd.f32 %v2001_v16, %v1961_v15  ;;  %v2751_v17 = vpop.f32.mrb[23].mxu1  ;;  %v2005_v18 = vmax.f32 %v1999_v13, 0.0 }
 0x33d   : > { %v2006_v19 = vmax.f32 %v2002_v4, 0.0 }
 0x33f   : > { %v2007_v20 = vpack.c.bf16 %v2006_v19, %v2005_v18 }
 0x341   : > { %2769 = vmatmul.mubr.bf16.vlgmr.msra.gmra.mrb[24].mxu1 %v2007_v20 }
 0x414   : > { %v2113_v22 = vpop.f32.mrb[24].mxu1 }
 0x415   : > { %v2770_v23 = vpop.f32.mrb[25].mxu1  ;;  %v2114_v25 = vadd.f32 %v2580_v21, %v2113_v22  ;;  %2136 = sbr.rel (!%p3764_p9) target bundleno = 1101 (0x44d), region = 68 }
 0x416   : > { %v2116_v24 = vpop.f32.mrb[26].mxu1 }
 0x417   : > { %v2117_v26 = vadd.f32 %v2580_v21, %v2116_v24  ;;  %v2771_v27 = vpop.f32.mrb[27].mxu1 }
 0x419   : > { %v2616_v28 = vpack.c.bf16 %v2117_v26, %v2114_v25 }
 0x41b   : > { %2617 = vst [vmem:[%s3687_s27] sm:$0xff] %v2616_v28  }
 0x41c   : > { %s3773_s24 = smov (!%p2139_p12, %s2138_s24), 2 }
 0x41d   : > { %s2593_s9 = sshll.u32 %s3773_s24, 6 }
 0x41e   : > { %p2596_p0 = scmp.eq.s32.totalorder %s2593_s9, 0 }
 0x41f   : > { %s3703_s12 = sshrl.u32 (!%p2596_p0), %s3773_s24, 1 }
 0x420   : > { %2147 = sbr.rel (%p2596_p0) target bundleno = 1101 (0x44d), region = 72  ;;  %p2597_p5 = scmp.le.s32.totalorder (!%p2596_p0), %s3703_s12, 0 }
 0x427   : > { %2314 = sbr.rel (%p2597_p5) target bundleno = 1080 (0x438), region = 150  ;;  %s3344_s28 = smov (!%p2597_p5), %s3697_s16  }
 0x428   : > { %s3348_s10 = smov (!%p2597_p5), %s3687_s27   ;;  %s3352_s21 = smov (!%p2597_p5), 0  }
 0x429   : > { %s3356_s8 = smov (!%p2597_p5), 0  }
 0x42e LB: >> { %v2163_v29 = vld [vmem:[%s3350_s10] sm:$0xf]  ;;  %v2165_v30 = vld [vmem:[%s3350_s10 + $0x4] sm:$0xf]  ;;  %s2167_s15 = sadd.s32 1, %s3354_s21  ;;  %s2157_s8 = sadd.s32 1, %s3358_s8   ;;  %s3358_s8 = sphi %s3356_s8, %s2157_s8   ;;  %s3354_s21 = sphi %s3352_s21, %s3353_s21   ;;  %s3350_s10 = sphi %s3348_s10, %s2172_s10   ;;  %s3346_s28 = sphi %s3344_s28, %s2173_s28  }
 0x42f   : >> { %2164 = vst [vmem:[%s3346_s28] sm:$0xf] %v2163_v29  ;;  %2166 = vst [vmem:[%s3346_s28 + $0x4] sm:$0xf] %v2165_v30  ;;  %p2168_p1 = scmp.ge.s32.totalorder %s2167_s15, %s3703_s12  ;;  %p2156_p4 = scmp.ge.s32.totalorder %s2157_s8, %s3703_s12 }
 0x431   : >> { %s3775_s15 = smov (%p2168_p1, %s2167_s15), 0  ;;  %2159 = sbr.rel (!%p2156_p4) target bundleno = 1070 (0x42e), region = 156 }
 0x432   : >> { %s2598_s18 = sshll.u32 %s3775_s15, 3  ;;  %s3353_s21 = smov %s3775_s15  }
 0x433   : >> { %s2172_s10 = scalar_lea.vmem %s3687_s27, %s2598_s18 [#allocation9]   ;;  %s2173_s28 = scalar_lea.vmem %s3697_s16, %s2598_s18  }
 0x438 PF: > { %s3713_s11 = sand.u32 1, %s3773_s24   ;;  %s2611_s13 = sshll.u32 %s3703_s12, 3 }
 0x439   : > { %s2178_s23 = scalar_lea.vmem %s3687_s27, %s2611_s13 [#allocation9]   ;;  %s2180_s30 = scalar_lea.vmem %s3697_s16, %s2611_s13  }
 0x43a   : > { %p2603_p8 = scmp.le.s32.totalorder %s3713_s11, 0 }
 0x43b   : > { %s3360_s29 = smov (!%p2603_p8), %s2180_s30   ;;  %s3364_s14 = smov (!%p2603_p8), %s2178_s23  }
 0x43c   : > { %2328 = sbr.rel (%p2603_p8) target bundleno = 1101 (0x44d), region = 161  ;;  %s3368_s17 = smov (!%p2603_p8), 0  }
 0x43d   : > { %s3372_s19 = smov (!%p2603_p8), 0  }
 0x443 LB: >> { %v2190_v31 = vld [vmem:[%s3366_s14] sm:$0xf]  ;;  %s2192_s1 = sadd.s32 1, %s3370_s17  ;;  %s2184_s19 = sadd.s32 1, %s3374_s19   ;;  %s3374_s19 = sphi %s3372_s19, %s2184_s19   ;;  %s3370_s17 = sphi %s3368_s17, %s3369_s17   ;;  %s3366_s14 = sphi %s3364_s14, %s2197_s14   ;;  %s3362_s29 = sphi %s3360_s29, %s2198_s29  }
 0x444   : >> { %2191 = vst [vmem:[%s3362_s29] sm:$0xf] %v2190_v31  ;;  %p2193_p11 = scmp.ge.s32.totalorder %s2192_s1, %s3713_s11  ;;  %p2183_p10 = scmp.ge.s32.totalorder %s2184_s19, %s3713_s11 }
 0x446   : >> { %s3777_s1 = smov (%p2193_p11, %s2192_s1), 0  ;;  %2186 = sbr.rel (!%p2183_p10) target bundleno = 1091 (0x443), region = 167 }
 0x447   : >> { %s2604_s27 = sshll.u32 %s3777_s1, 2  ;;  %s3369_s17 = smov %s3777_s1  }
 0x448   : >> { %s2197_s14 = scalar_lea.vmem %s2178_s23, %s2604_s27 [#allocation9]   ;;  %s2198_s29 = scalar_lea.vmem %s2180_s30, %s2604_s27  }
 0x44d PF: > { %s3765_s27 = sld [smem:[#allocation13_spill]]  ;;  %s3766_s20 = sld [smem:[#allocation14_spill]] }
 0x44e   : > { %s3767_s24 = smov %s3334_s25  ;;  %s3768_s25 = smov %s3338_s26 }
 0x453   : > { %p19_p2 = scmp.ge.s32.totalorder %s3765_s27, 5   ;;  %s3769_s26 = smov %s3766_s20 }
 0x455   :  { %21 = sbr.rel (!%p19_p2) target bundleno = 7 (0x7), region = 178 }
 0x45c   :  { %2261 = vsyncpa [#allocation3], 1 }
 0x45d   :  { %2263 = vsyncpa [#allocation3 + $0x1], 1 }
 0x45e   :  { %2264 = vsyncpa [#allocation5], 1 }
 0x45f   :  { %2265 = vsyncpa [#allocation8], 1 }

</bundles_post_ra>
